<compile_context>
chip_gen: v7x
topology: tpu7x:2x2x1
jax: 0.10.0
libtpu: 0.0.40
codegen_flags: <defaults>
</compile_context>

<pallas_src>
import functools

import jax
import jax.numpy as jnp
from jax.experimental import pallas as pl
from jax.experimental.pallas import tpu as pltpu

LN_EPS = 1e-5


# --------------------------------------------------------------------------
# VMEM budgeting helpers (generation-aware)
# --------------------------------------------------------------------------
def _vmem_capacity_bytes():
    try:
        info = pltpu.get_tpu_info()
        cap = int(getattr(info, "vmem_capacity_bytes", 0))
        if cap > 0:
            return cap
    except Exception:
        pass
    return 64 << 20  # conservative fallback: v7x per-TensorCore VMEM


def _vmem_footprint(bb, N, C, D, x_bytes, o_bytes):
    """Per-step VMEM estimate: double-buffered activation/output tiles,
    (worst-case double-buffered) resident weight/bias, plus in-kernel f32
    temporaries (x f32, xn bf16) and the f32 accumulator."""
    n_out = N - 1
    tiles = 2 * bb * N * C * x_bytes + 2 * bb * n_out * D * o_bytes
    weights = 2 * (C * D * 2 + D * 4)
    temps = bb * n_out * (2 * C * 4 + C * 2 + 2 * D * 4)
    return tiles + weights + temps


def _choose_bb(B, N, C, D, x_bytes, o_bytes, budget):
    """Batch-block size: as large as the VMEM budget allows, but keep >= 2
    grid steps when B >= 2 so both v7x TensorCores get work."""
    bb = B if B < 2 else max(1, B // 2)
    bb = min(bb, max(1, 4096 // max(N, 1)))  # keep per-step row count sane
    while bb > 1 and _vmem_footprint(bb, N, C, D, x_bytes, o_bytes) > budget:
        bb //= 2
    return max(bb, 1)


# --------------------------------------------------------------------------
# Kernel
# --------------------------------------------------------------------------
def _ln_proj_kernel(x_ref, w_ref, b_ref, o_ref):
    """Fused LayerNorm (affine folded into W'/b') + bf16 MXU projection.

    x_ref: (bb, N, C) raw tokens including CLS; o_ref: (bb, N-1, D).
    """
    # CLS-token drop fused into the load (static offset on the token axis).
    x = x_ref[:, 1:, :].astype(jnp.float32)                 # (bb, N-1, C)
    inv_c = 1.0 / x.shape[-1]
    # One-pass LN statistics: E[x], E[x^2].
    s1 = jnp.sum(x, axis=-1, keepdims=True)
    s2 = jnp.sum(x * x, axis=-1, keepdims=True)
    mean = s1 * inv_c
    var = jnp.maximum(s2 * inv_c - mean * mean, 0.0)
    xn = ((x - mean) * jax.lax.rsqrt(var + LN_EPS)).astype(jnp.bfloat16)
    acc = jnp.einsum("bnc,cd->bnd", xn, w_ref[...],
                     preferred_element_type=jnp.float32)     # bf16 MXU matmul
    o_ref[...] = (acc + b_ref[...].astype(jnp.float32)).astype(o_ref.dtype)


@functools.partial(
    jax.jit, static_argnames=("bb", "single_buffer_weights", "vmem_limit"))
def _ln_proj_call(x, w_bf16, bias_row, *, bb, single_buffer_weights, vmem_limit):
    """x: (B, N, C) tokens incl. CLS; w_bf16: (C, D) folded weight;
    bias_row: (1, D) folded bias.  Returns (B, N-1, D) in x.dtype."""
    B, N, C = x.shape
    D = w_bf16.shape[1]
    # Grid-invariant operands never get re-fetched; single-buffer them to save
    # VMEM (matters on v7x's 64 MiB).  Guarded by the fallback in _run_ln_proj.
    resident = {"pipeline_mode": pl.Buffered(1)} if single_buffer_weights else {}
    grid = (pl.cdiv(B, bb),)
    return pl.pallas_call(
        _ln_proj_kernel,
        out_shape=jax.ShapeDtypeStruct((B, N - 1, D), x.dtype),
        grid_spec=pltpu.PrefetchScalarGridSpec(
            num_scalar_prefetch=0,
            grid=grid,
            in_specs=[
                pl.BlockSpec((bb, N, C), lambda i: (i, 0, 0)),       # activations
                pl.BlockSpec((C, D), lambda i: (0, 0), **resident),  # folded weight
                pl.BlockSpec((1, D), lambda i: (0, 0), **resident),  # folded bias
            ],
            out_specs=pl.BlockSpec((bb, N - 1, D), lambda i: (i, 0, 0)),
        ),
        compiler_params=pltpu.CompilerParams(
            dimension_semantics=("parallel",),  # shard batch blocks across TCs
            vmem_limit_bytes=vmem_limit,
        ),
    )(x, w_bf16, bias_row)


def _run_ln_proj(x, w_bf16, bias_row, *, bb, vmem_limit):
    try:
        return _ln_proj_call(x, w_bf16, bias_row, bb=bb,
                             single_buffer_weights=True, vmem_limit=vmem_limit)
    except Exception:
        # Some Pallas versions reject Buffered(1) / pipeline_mode; fall back to
        # default double buffering (extra C*D*2 bytes, already in the budget).
        return _ln_proj_call(x, w_bf16, bias_row, bb=bb,
                             single_buffer_weights=False, vmem_limit=vmem_limit)


# --------------------------------------------------------------------------
# Wrapper (LinearLayer.forward equivalent)
# --------------------------------------------------------------------------
def linear_layer_forward(tokens, ln_weight, ln_bias, proj):
    """JAX/Pallas equivalent of LinearLayer.forward for a list of 3-D tokens.

    tokens[i]: (B, N, C) -> (B, N-1, D).  Output dtype matches input dtype,
    so passing bf16 activations halves HBM traffic (LN stats stay f32).
    """
    C, D = proj.shape
    gamma = ln_weight.astype(jnp.float32)
    beta = ln_bias.astype(jnp.float32)
    proj_f32 = proj.astype(jnp.float32)
    w_bf16 = (gamma[:, None] * proj_f32).astype(jnp.bfloat16)  # fold LN scale
    bias_row = beta[None, :] @ proj_f32                        # fold LN shift (1, D) f32

    cap = _vmem_capacity_bytes()
    budget = max(24 << 20, int(cap * 0.55))  # leave headroom for compiler scratch

    out = []
    for t in tokens:
        assert t.ndim == 3, "only the 3-D (ViT) path is implemented"
        # TODO(synk): 4-D branch in PyTorch is `assert 1 == 2` (unreachable).
        B, N, Ct = t.shape
        assert Ct == C and N >= 2
        nbytes = jnp.dtype(t.dtype).itemsize
        bb = _choose_bb(B, N, C, D, nbytes, nbytes, budget)
        fp = _vmem_footprint(bb, N, C, D, nbytes, nbytes)
        vmem_limit = int(max(32 << 20, min(cap - (4 << 20), fp + (16 << 20))))
        out.append(_run_ln_proj(t, w_bf16, bias_row, bb=bb, vmem_limit=vmem_limit))
    return out


# --------------------------------------------------------------------------
# Reference + demo
# --------------------------------------------------------------------------
def _reference(tokens, ln_weight, ln_bias, proj):
    out = []
    for t in tokens:
        x = t[:, 1:, :].astype(jnp.float32)
        mean = jnp.mean(x, axis=-1, keepdims=True)
        var = jnp.mean((x - mean) ** 2, axis=-1, keepdims=True)
        xn = (x - mean) / jnp.sqrt(var + LN_EPS)
        y = xn * ln_weight + ln_bias
        out.append(y @ proj.astype(jnp.float32))
    return out


if __name__ == "__main__":
    key = jax.random.PRNGKey(0)
    B, N, C, D = 2, 9, 32, 16  # small ViT-like shapes: 9 tokens incl. CLS

    k1, k2, k3, k4, k5 = jax.random.split(key, 5)
    ln_weight = 1.0 + 0.02 * jax.random.normal(k1, (C,), jnp.float32)
    ln_bias = 0.01 * jax.random.normal(k2, (C,), jnp.float32)
    proj = jax.random.normal(k3, (C, D), jnp.float32) / jnp.sqrt(C)

    tokens = [
        jax.random.normal(k4, (B, N, C), jnp.float32),
        jax.random.normal(k5, (B, N, C), jnp.float32),
    ]

    out = linear_layer_forward(tokens, ln_weight, ln_bias, proj)
    out = [jax.block_until_ready(o) for o in out]

    ref = _reference(tokens, ln_weight, ln_bias, proj)
    for o, r in zip(out, ref):
        assert o.shape == (B, N - 1, D), o.shape
        # bf16 MXU matmul -> loosened tolerance (LN stats remain f32)
        err = float(jnp.max(jnp.abs(o.astype(jnp.float32) - r)))
        assert jnp.allclose(o.astype(jnp.float32), r, atol=3e-2, rtol=3e-2), err

    print("KERNEL_OK")
</pallas_src>

<mosaic_0001>
module attributes {stable_mosaic.version = 11 : i64} {
  func.func @_ln_proj_kernel(%arg0: i32, %arg1: memref<1x9x32xf32, #tpu.memory_space<vmem>>, %arg2: memref<32x16xbf16, #tpu.memory_space<vmem>>, %arg3: memref<1x16xf32, #tpu.memory_space<vmem>>, %arg4: memref<1x8x16xf32, #tpu.memory_space<vmem>>) attributes {dimension_semantics = [#tpu.dimension_semantics<parallel>], iteration_bounds = array<i64: 2>, scalar_prefetch = 0 : i64, scratch_operands = 0 : i64, tpu.core_type = #tpu.core_type<tc>, window_params = [{transform_indices = @transform_0, window_bounds = array<i64: 1, 9, 32>}, {pipeline_mode = #tpu.pipeline_mode<synchronous>, transform_indices = @transform_1, window_bounds = array<i64: 32, 16>}, {pipeline_mode = #tpu.pipeline_mode<synchronous>, transform_indices = @transform_2, window_bounds = array<i64: 1, 16>}, {transform_indices = @transform_3, window_bounds = array<i64: 1, 8, 16>}]} {
    %c0 = arith.constant 0 : index
    %c1 = arith.constant 1 : index
    %c0_0 = arith.constant 0 : index
    %0 = vector.load %arg1[%c0, %c1, %c0_0] : memref<1x9x32xf32, #tpu.memory_space<vmem>>, vector<1x8x32xf32>
    %cst = arith.constant dense<0.000000e+00> : vector<1x8xf32>
    %1 = vector.multi_reduction <add>, %0, %cst [2] : vector<1x8x32xf32> to vector<1x8xf32>
    %2 = vector.shape_cast %1 : vector<1x8xf32> to vector<1x8x1xf32>
    %3 = arith.mulf %0, %0 : vector<1x8x32xf32>
    %cst_1 = arith.constant dense<0.000000e+00> : vector<1x8xf32>
    %4 = vector.multi_reduction <add>, %3, %cst_1 [2] : vector<1x8x32xf32> to vector<1x8xf32>
    %5 = vector.shape_cast %4 : vector<1x8xf32> to vector<1x8x1xf32>
    %cst_2 = arith.constant 3.125000e-02 : f32
    %6 = vector.broadcast %cst_2 : f32 to vector<1x8x1xf32>
    %7 = arith.mulf %2, %6 : vector<1x8x1xf32>
    %cst_3 = arith.constant 3.125000e-02 : f32
    %8 = vector.broadcast %cst_3 : f32 to vector<1x8x1xf32>
    %9 = arith.mulf %5, %8 : vector<1x8x1xf32>
    %10 = arith.mulf %7, %7 : vector<1x8x1xf32>
    %11 = arith.subf %9, %10 : vector<1x8x1xf32>
    %cst_4 = arith.constant 0.000000e+00 : f32
    %12 = vector.broadcast %cst_4 : f32 to vector<1x8x1xf32>
    %13 = arith.maximumf %11, %12 : vector<1x8x1xf32>
    %14 = vector.broadcast %7 : vector<1x8x1xf32> to vector<1x8x32xf32>
    %15 = arith.subf %0, %14 : vector<1x8x32xf32>
    %cst_5 = arith.constant 9.99999974E-6 : f32
    %16 = vector.broadcast %cst_5 : f32 to vector<1x8x1xf32>
    %17 = arith.addf %13, %16 : vector<1x8x1xf32>
    %18 = math.rsqrt %17 : vector<1x8x1xf32>
    %19 = vector.broadcast %18 : vector<1x8x1xf32> to vector<1x8x32xf32>
    %20 = arith.mulf %15, %19 : vector<1x8x32xf32>
    %21 = arith.truncf %20 : vector<1x8x32xf32> to vector<1x8x32xbf16>
    %c0_6 = arith.constant 0 : index
    %c0_7 = arith.constant 0 : index
    %22 = vector.load %arg2[%c0_6, %c0_7] : memref<32x16xbf16, #tpu.memory_space<vmem>>, vector<32x16xbf16>
    "tpu.trace_start"() <{level = 10 : i32, message = "bnc,cd->bnd"}> : () -> ()
    %cst_8 = arith.constant dense<0.000000e+00> : vector<1x8x16xf32>
    %23 = tpu.matmul %21, %22, %cst_8 {dimension_numbers = #tpu.dot_dimension_numbers<[2], [0], [0, 1], [1], [0, 0, 0, 1, 1, 1], [], []>} : vector<1x8x32xbf16>, vector<32x16xbf16>, vector<1x8x16xf32> -> vector<1x8x16xf32>
    "tpu.trace_stop"() : () -> ()
    %c0_9 = arith.constant 0 : index
    %c0_10 = arith.constant 0 : index
    %24 = vector.load %arg3[%c0_9, %c0_10] : memref<1x16xf32, #tpu.memory_space<vmem>>, vector<1x16xf32>
    %25 = vector.shape_cast %24 : vector<1x16xf32> to vector<1x1x16xf32>
    %26 = vector.broadcast %25 : vector<1x1x16xf32> to vector<1x8x16xf32>
    %27 = arith.addf %23, %26 : vector<1x8x16xf32>
    %c0_11 = arith.constant 0 : index
    %c0_12 = arith.constant 0 : index
    %c0_13 = arith.constant 0 : index
    %28 = vector.load %arg4[%c0_11, %c0_12, %c0_13] : memref<1x8x16xf32, #tpu.memory_space<vmem>>, vector<1x8x16xf32>
    tpu.vector_store %arg4[%c0_11, %c0_12, %c0_13], %27 {strides = array<i32>} : memref<1x8x16xf32, #tpu.memory_space<vmem>>, vector<1x8x16xf32>,
    return
  }
  func.func @transform_0(%arg0: i32) -> (i32, i32, i32) {
    %c0_i32 = arith.constant 0 : i32
    %c0_i32_0 = arith.constant 0 : i32
    %c0_i32_1 = arith.constant 0 : i32
    return %arg0, %c0_i32, %c0_i32_0 : i32, i32, i32
  }
  func.func @transform_1(%arg0: i32) -> (i32, i32) {
    %c0_i32 = arith.constant 0 : i32
    %c0_i32_0 = arith.constant 0 : i32
    %c0_i32_1 = arith.constant 0 : i32
    return %c0_i32, %c0_i32_0 : i32, i32
  }
  func.func @transform_2(%arg0: i32) -> (i32, i32) {
    %c0_i32 = arith.constant 0 : i32
    %c0_i32_0 = arith.constant 0 : i32
    %c0_i32_1 = arith.constant 0 : i32
    return %c0_i32, %c0_i32_0 : i32, i32
  }
  func.func @transform_3(%arg0: i32) -> (i32, i32, i32) {
    %c0_i32 = arith.constant 0 : i32
    %c0_i32_0 = arith.constant 0 : i32
    %c0_i32_1 = arith.constant 0 : i32
    return %arg0, %c0_i32, %c0_i32_0 : i32, i32, i32
  }
}

module attributes {stable_mosaic.version = 11 : i64} {
  func.func @_ln_proj_kernel(%arg0: i32, %arg1: memref<1x9x32xf32, #tpu.memory_space<vmem>>, %arg2: memref<32x16xbf16, #tpu.memory_space<vmem>>, %arg3: memref<1x16xf32, #tpu.memory_space<vmem>>, %arg4: memref<1x8x16xf32, #tpu.memory_space<vmem>>) attributes {dimension_semantics = [#tpu.dimension_semantics<parallel>], iteration_bounds = array<i64: 2>, scalar_prefetch = 0 : i64, scratch_operands = 0 : i64, tpu.core_type = #tpu.core_type<tc>, window_params = [{transform_indices = @transform_0, window_bounds = array<i64: 1, 9, 32>}, {pipeline_mode = #tpu.pipeline_mode<synchronous>, transform_indices = @transform_1, window_bounds = array<i64: 32, 16>}, {pipeline_mode = #tpu.pipeline_mode<synchronous>, transform_indices = @transform_2, window_bounds = array<i64: 1, 16>}, {transform_indices = @transform_3, window_bounds = array<i64: 1, 8, 16>}]} {
    %c0 = arith.constant 0 : index
    %c1 = arith.constant 1 : index
    %c0_0 = arith.constant 0 : index
    %0 = vector.load %arg1[%c0, %c1, %c0_0] : memref<1x9x32xf32, #tpu.memory_space<vmem>>, vector<1x8x32xf32>
    %cst = arith.constant dense<0.000000e+00> : vector<1x8xf32>
    %1 = vector.multi_reduction <add>, %0, %cst [2] : vector<1x8x32xf32> to vector<1x8xf32>
    %2 = vector.shape_cast %1 : vector<1x8xf32> to vector<1x8x1xf32>
    %3 = arith.mulf %0, %0 : vector<1x8x32xf32>
    %cst_1 = arith.constant dense<0.000000e+00> : vector<1x8xf32>
    %4 = vector.multi_reduction <add>, %3, %cst_1 [2] : vector<1x8x32xf32> to vector<1x8xf32>
    %5 = vector.shape_cast %4 : vector<1x8xf32> to vector<1x8x1xf32>
    %cst_2 = arith.constant 3.125000e-02 : f32
    %6 = vector.broadcast %cst_2 : f32 to vector<1x8x1xf32>
    %7 = arith.mulf %2, %6 : vector<1x8x1xf32>
    %cst_3 = arith.constant 3.125000e-02 : f32
    %8 = vector.broadcast %cst_3 : f32 to vector<1x8x1xf32>
    %9 = arith.mulf %5, %8 : vector<1x8x1xf32>
    %10 = arith.mulf %7, %7 : vector<1x8x1xf32>
    %11 = arith.subf %9, %10 : vector<1x8x1xf32>
    %cst_4 = arith.constant 0.000000e+00 : f32
    %12 = vector.broadcast %cst_4 : f32 to vector<1x8x1xf32>
    %13 = arith.maximumf %11, %12 : vector<1x8x1xf32>
    %14 = vector.broadcast %7 : vector<1x8x1xf32> to vector<1x8x32xf32>
    %15 = arith.subf %0, %14 : vector<1x8x32xf32>
    %cst_5 = arith.constant 9.99999974E-6 : f32
    %16 = vector.broadcast %cst_5 : f32 to vector<1x8x1xf32>
    %17 = arith.addf %13, %16 : vector<1x8x1xf32>
    %18 = math.rsqrt %17 : vector<1x8x1xf32>
    %19 = vector.broadcast %18 : vector<1x8x1xf32> to vector<1x8x32xf32>
    %20 = arith.mulf %15, %19 : vector<1x8x32xf32>
    %21 = arith.truncf %20 : vector<1x8x32xf32> to vector<1x8x32xbf16>
    %c0_6 = arith.constant 0 : index
    %c0_7 = arith.constant 0 : index
    %22 = vector.load %arg2[%c0_6, %c0_7] : memref<32x16xbf16, #tpu.memory_space<vmem>>, vector<32x16xbf16>
    "tpu.trace_start"() <{level = 10 : i32, message = "bnc,cd->bnd"}> : () -> ()
    %cst_8 = arith.constant dense<0.000000e+00> : vector<1x8x16xf32>
    %23 = tpu.matmul %21, %22, %cst_8 {dimension_numbers = #tpu.dot_dimension_numbers<[2], [0], [0, 1], [1], [0, 0, 0, 1, 1, 1], [], []>} : vector<1x8x32xbf16>, vector<32x16xbf16>, vector<1x8x16xf32> -> vector<1x8x16xf32>
    "tpu.trace_stop"() : () -> ()
    %c0_9 = arith.constant 0 : index
    %c0_10 = arith.constant 0 : index
    %24 = vector.load %arg3[%c0_9, %c0_10] : memref<1x16xf32, #tpu.memory_space<vmem>>, vector<1x16xf32>
    %25 = vector.shape_cast %24 : vector<1x16xf32> to vector<1x1x16xf32>
    %26 = vector.broadcast %25 : vector<1x1x16xf32> to vector<1x8x16xf32>
    %27 = arith.addf %23, %26 : vector<1x8x16xf32>
    %c0_11 = arith.constant 0 : index
    %c0_12 = arith.constant 0 : index
    %c0_13 = arith.constant 0 : index
    %28 = vector.load %arg4[%c0_11, %c0_12, %c0_13] : memref<1x8x16xf32, #tpu.memory_space<vmem>>, vector<1x8x16xf32>
    tpu.vector_store %arg4[%c0_11, %c0_12, %c0_13], %27 {strides = array<i32>} : memref<1x8x16xf32, #tpu.memory_space<vmem>>, vector<1x8x16xf32>,
    return
  }
  func.func @transform_0(%arg0: i32) -> (i32, i32, i32) {
    %c0_i32 = arith.constant 0 : i32
    %c0_i32_0 = arith.constant 0 : i32
    %c0_i32_1 = arith.constant 0 : i32
    return %arg0, %c0_i32, %c0_i32_0 : i32, i32, i32
  }
  func.func @transform_1(%arg0: i32) -> (i32, i32) {
    %c0_i32 = arith.constant 0 : i32
    %c0_i32_0 = arith.constant 0 : i32
    %c0_i32_1 = arith.constant 0 : i32
    return %c0_i32, %c0_i32_0 : i32, i32
  }
  func.func @transform_2(%arg0: i32) -> (i32, i32) {
    %c0_i32 = arith.constant 0 : i32
    %c0_i32_0 = arith.constant 0 : i32
    %c0_i32_1 = arith.constant 0 : i32
    return %c0_i32, %c0_i32_0 : i32, i32
  }
  func.func @transform_3(%arg0: i32) -> (i32, i32, i32) {
    %c0_i32 = arith.constant 0 : i32
    %c0_i32_0 = arith.constant 0 : i32
    %c0_i32_1 = arith.constant 0 : i32
    return %arg0, %c0_i32, %c0_i32_0 : i32, i32, i32
  }
}

</mosaic_0001>

<bundles_post_ra>
// kernel: _ln_proj_call.1
= control target key start
LH: loop header
LB: loop body
LE: loop exit
PB: predicated region body
PF: predicated region fallthrough
CT: control target
= control target key end

     0   :  { %8 = vsyncpa [#allocation3], 0  ;;  %s601_s0 = inlined_call_operand.vmem [shape: f32[2,9,32], index: 0, kind: input, shape index: {}]   ;;  %s602_s1 = inlined_call_operand.vmem [shape: bf16[32,16], index: 1, kind: input, shape index: {}]   ;;  %s603_s2 = inlined_call_operand.vmem [shape: f32[1,16], index: 2, kind: input, shape index: {}]   ;;  %s604_s3 = inlined_call_operand.hbm [shape: f32[2,8,16], index: 3, kind: output, shape index: {}]  }
   0x1   :  { %10 = vsyncpa [#allocation3 + $0x1], 0  ;;  %s489_s12 = smov 0   ;;  %s491_s13 = smov 0  }
   0x2   :  { %s493_s14 = smov 0   ;;  %s495_s15 = smov 0  }
   0x3 LB: > { %s510_s16 = sadd.s32 4294967295, %s464_s15   ;;  %s330_s17 = sadd.s32 4294967294, %s464_s15   ;;  %s464_s15 = sphi %s495_s15, %s610_s15   ;;  %s460_s14 = sphi %s493_s14, %s609_s14   ;;  %s456_s13 = sphi %s491_s13, %s608_s13   ;;  %s452_s12 = sphi %s489_s12, %s607_s12  }
   0x4   : > { %s514_s18 = sadd.s32 1, %s464_s15   ;;  %s91_s19 = sadd.s32 1, %s460_s14 }
   0x5   : > { %s88_s20 = ssub.s32 %s464_s15, %s514_s18  ;;  %p101_p0 = scmp.ne.s32.totalorder %s460_s14, %s456_s13 }
   0x6   : > { %p89_p1 = scmp.eq.s32.totalorder %s88_s20, 0  ;;  %p102_p2 = scmp.eq.s32.totalorder %s510_s16, 1 }
   0x7   : > { %p107_p3 = scmp.ne.s32.totalorder %s456_s13, %s452_s12  ;;  %p108_p4 = scmp.eq.s32.totalorder %s330_s17, 1 }
   0x8   : > { %s525_s21 = scalar_select %p89_p1, %s460_s14, %s91_s19  }
   0x9   : > { %p527_p5 = por %p102_p2, %p101_p0  ;;  %p531_p6 = por %p108_p4, %p107_p3 }
   0xa   : > { %p333_p7 = scmp.ge.s32.totalorder %s464_s15, 1  ;;  %p140_p8 = scmp.lt.s32.totalorder %s464_s15, 3 }
   0xc   : > { %p141_p9 = pnand %p333_p7, %p140_p8 }
   0xd   : > { %p164_p10 = scmp.lt.s32.totalorder (!%p141_p9), %s510_s16, 1  ;;  %vm171_vm0 = vcmask (!%p141_p9), 261120   ;;  %v398_v4 = vld [vmem:[%s602_s1] sm:$0xff] (!%p141_p9)   ;;  %v466_v5 = vmov (!%p141_p9), 0.0   ;;  %vm467_vm1 = vmmov (!%p141_p9), 0   ;;  %v399_v6 = vld [vmem:[%s602_s1 + $0x8] sm:$0xff] (!%p141_p9)  }
   0xe   : > { %144 = sbr.rel (%p141_p9) target bundleno = 424 (0x1a8), region = 32  ;;  %349 = vmatprep.subr.bf16.mxu0 (!%p141_p9), %v466_v5  ;;  %353 = vmatprep.mubr.msk.bf16.mxu0 (!%p141_p9), %vm467_vm1, %v466_v5  ;;  %s161_s6 = sand.u32 (!%p141_p9), 1, %s456_s13   ;;  %v337_v19 = vld [vmem:[%s603_s2] ss:$0 sm:$0xff] (!%p141_p9)  ;;  %vm255_vm2 = vcmask (!%p141_p9), 130048  }
   0xf   : > { %350 = vmatpush3.bf16.msra.mxu0 (!%p141_p9), %v398_v4  ;;  %s334_s7 = sshll.u32 (!%p141_p9), %s161_s6, 3  ;;  %s342_s10 = sshll.u32 (!%p141_p9), %s510_s16, 7 }
  0x10   : > { %351 = vmatprep.subr.bf16.mxu0 (!%p141_p9), %v466_v5  ;;  %s163_s11 = scalar_lea.vmem (!%p141_p9), [#allocation2], %s334_s7  ;;  %s468_s26 = smov (!%p141_p9), [#allocation2]  }
  0x11   : > { %s271_s17 = sshll.u32 (!%p141_p9), %s163_s11, 4  ;;  %s406_s27 = sshll.u32 (!%p141_p9), %s468_s26, 4  ;;  %s561_s17 = int_to_ptr.vmem [resolvable:$true] %s271_s17  ;;  %s407_s27 = int_to_ptr.vmem [resolvable:$false] %s406_s27 }
  0x12   : > { %p409_p0 = scmp.lt.s32.totalorder (!%p141_p9), %s561_s17, %s407_s27 }
  0x13   : > { %352 = vmatpush3.bf16.msra.mxu0 (!%p141_p9), %v399_v6 }
  0x15   : > { %s165_s24 = scalar_select %p164_p10, %s510_s16, 1 }
  0x16   : > { %s258_s16 = scalar_lea.sflag [#allocation3], %s161_s6 }
  0x17   : > { %s345_s25 = sshll.u32 %s165_s24, 4  ;;  %s559_s24 = scalar_lea.hbm %s604_s3, %s342_s10 }
  0x18   : > { %s168_s28 = scalar_lea.vmem %s601_s0, %s345_s25  ;;  %s402_s25 = scalar_lea.vmem %s561_s17, 128 }
  0x19   : > { %v170_v0 = vld [vmem:[%s168_s28 + $0x1] sm:$0xff]  ;;  %p403_p11 = scmp.ne.s32.totalorder %s561_s17, %s402_s25  ;;  %s408_s28 = scalar_lea.vmem %s407_s27, 256 }
  0x1a   : > { %v172_v1 = vsel %vm171_vm0, %v170_v0, 0.0  ;;  %v175_v2 = vmul.f32 %v170_v0, %v170_v0  ;;  %p410_p1 = scmp.lt.s32.totalorder %s408_s28, %s402_s25 }
  0x1b   : > { %173 = vadd.xlane.f32.xlu0 %v172_v1  ;;  %p404_p12 = pnand %p403_p11, %p527_p5 }
  0x1c   : > { %v176_v3 = vsel %vm171_vm0, %v175_v2, 0.0  ;;  %p411_p2 = por %p410_p1, %p409_p0 }
  0x1d   : > { %p405_p13 = pneg %p404_p12 }
  0x1f   : > { %177 = vadd.xlane.f32.xlu0 %v176_v3  ;;  %p412_p3 = pnand %p411_p2, %p405_p13 }
  0xa8   : > { %v174_v7 = vpop.xlane.xlu0 %173 }
  0xa9   : > { %v179_v8 = vmul.f32 0.03125, %v174_v7 }
  0xab   : > { %v181_v10 = vmul.f32 %v179_v8, %v179_v8  ;;  %v184_v15 = vsub.f32 %v170_v0, %v179_v8 }
  0xac   : > { %v178_v9 = vpop.xlane.xlu0 %177 }
  0xad   : > { %v180_v11 = vmul.f32 0.03125, %v178_v9 }
  0xaf   : > { %v182_v12 = vsub.f32 %v180_v11, %v181_v10 }
  0xb1   : > { %v183_v13 = vmax.f32 %v182_v12, 0.0 }
  0xb3   : > { %v185_v14 = vadd.f32 1e-05, %v183_v13 }
  0xb5   : > { %400 = vrsqrt.f32 %v185_v14 }
  0xbf   : > { %v401_v16 = vpop.eup %400 }
  0xc0   : > { %v187_v17 = vmul.f32 %v401_v16, %v184_v15 }
  0xc2   : > { %v188_v18 = vpack.c.bf16 %v187_v17, %v187_v17 }
  0xc4   : > { %354 = vmatmul.mubr.msk.bf16.vlgmr.msra.gmra.mrb[0].mxu0 %vm171_vm0, %v188_v18 }
 0x197   : > { %v249_v20 = vpop.f32.mrb[0].mxu0 }
 0x198   : > { %v250_v21 = vadd.f32 %v337_v19, %v249_v20  ;;  %v355_v22 = vpop.f32.mrb[1].mxu0 }
 0x199   : > { %v252_v23 = vpop.f32.mrb[2].mxu0 }
 0x19a   : > { %v356_v24 = vpop.f32.mrb[3].mxu0  ;;  %256 = vst.msk [vmem:[%s163_s11] sm:$0xff] %vm255_vm2, %v250_v21 }
 0x19b   : > { %415 = shalt.err (!%p412_p3)
}
 0x19c   : > { %s416_s29 = scalar_lea.hbm %s559_s24, 128  ;;  %s420_s5 = scalar_lea.hbm %s604_s3, 256 }
 0x19d   : > { %p417_p4 = scmp.ne.s32.totalorder %s559_s24, %s416_s29  ;;  %p421_p9 = scmp.lt.u32.totalorder %s559_s24, %s604_s3 }
 0x19e   : > { %p422_p10 = scmp.lt.u32.totalorder %s420_s5, %s416_s29  ;;  %p424_p12 = scmp.lt.u32.totalorder %s416_s29, %s559_s24 }
 0x19f   : > { %p418_p7 = pnand %p417_p4, %p527_p5 }
 0x1a0   : > { %p423_p11 = por %p422_p10, %p421_p9 }
 0x1a1   : > { %p419_p8 = pneg %p418_p7 }
 0x1a2   : > { %p425_p13 = por %p424_p12, %p423_p11 }
 0x1a4   : > { %p426_p0 = pnand %p425_p13, %p419_p8 }
 0x1a6   : > { %429 = shalt.err (!%p426_p0)
}
 0x1a7   : > { %357 = dma.vmem_to_hbm [thread:$0]  (%p527_p5), %s561_s17, 128, %s559_s24, %s258_s16  }
 0x1a8 PF: > { %p363_p1 = scmp.ge.s32.totalorder %s464_s15, 2  ;;  %s283_s8 = sand.u32 1, %s452_s12  }
 0x1a9   : > { %s284_s9 = scalar_lea.sflag [#allocation3], %s283_s8 }
 0x1aa   : > { %p360_p2 = pnand %p363_p1, %p531_p6 }
 0x1ac   : > { %447 = dma.done.wait (!%p360_p2), %s284_s9, 128  }
 0x1ad   : > { %449 = vsyncadd (!%p360_p2), %s284_s9, 4294967168  ;;  %p13_p3 = scmp.ge.s32.totalorder %s514_s18, 4   ;;  %s607_s12 = smov %s456_s13 }
 0x1ae   : > { %s608_s13 = smov %s460_s14  ;;  %s609_s14 = smov %s525_s21 }
 0x1af   : > { %s610_s15 = smov %s514_s18  ;;  %15 = sbr.rel (!%p13_p3) target bundleno = 3 (0x3), region = 67 }
 0x1b6   :  { %289 = vsyncpa [#allocation3], 1 }
 0x1b7   :  { %291 = vsyncpa [#allocation3 + $0x1], 1 }

// kernel: _ln_proj_call.1
= control target key start
LH: loop header
LB: loop body
LE: loop exit
PB: predicated region body
PF: predicated region fallthrough
CT: control target
= control target key end

     0   :  { %8 = vsyncpa [#allocation3], 0  ;;  %s601_s0 = inlined_call_operand.vmem [shape: f32[2,9,32], index: 0, kind: input, shape index: {}]   ;;  %s602_s1 = inlined_call_operand.vmem [shape: bf16[32,16], index: 1, kind: input, shape index: {}]   ;;  %s603_s2 = inlined_call_operand.vmem [shape: f32[1,16], index: 2, kind: input, shape index: {}]   ;;  %s604_s3 = inlined_call_operand.hbm [shape: f32[2,8,16], index: 3, kind: output, shape index: {}]  }
   0x1   :  { %10 = vsyncpa [#allocation3 + $0x1], 0  ;;  %s489_s12 = smov 0   ;;  %s491_s13 = smov 0  }
   0x2   :  { %s493_s14 = smov 0   ;;  %s495_s15 = smov 0  }
   0x3 LB: > { %s510_s16 = sadd.s32 4294967295, %s464_s15   ;;  %s330_s17 = sadd.s32 4294967294, %s464_s15   ;;  %s464_s15 = sphi %s495_s15, %s610_s15   ;;  %s460_s14 = sphi %s493_s14, %s609_s14   ;;  %s456_s13 = sphi %s491_s13, %s608_s13   ;;  %s452_s12 = sphi %s489_s12, %s607_s12  }
   0x4   : > { %s514_s18 = sadd.s32 1, %s464_s15   ;;  %s91_s19 = sadd.s32 1, %s460_s14 }
   0x5   : > { %s88_s20 = ssub.s32 %s464_s15, %s514_s18  ;;  %p101_p0 = scmp.ne.s32.totalorder %s460_s14, %s456_s13 }
   0x6   : > { %p89_p1 = scmp.eq.s32.totalorder %s88_s20, 0  ;;  %p102_p2 = scmp.eq.s32.totalorder %s510_s16, 1 }
   0x7   : > { %p107_p3 = scmp.ne.s32.totalorder %s456_s13, %s452_s12  ;;  %p108_p4 = scmp.eq.s32.totalorder %s330_s17, 1 }
   0x8   : > { %s525_s21 = scalar_select %p89_p1, %s460_s14, %s91_s19  }
   0x9   : > { %p527_p5 = por %p102_p2, %p101_p0  ;;  %p531_p6 = por %p108_p4, %p107_p3 }
   0xa   : > { %p333_p7 = scmp.ge.s32.totalorder %s464_s15, 1  ;;  %p140_p8 = scmp.lt.s32.totalorder %s464_s15, 3 }
   0xc   : > { %p141_p9 = pnand %p333_p7, %p140_p8 }
   0xd   : > { %p164_p10 = scmp.lt.s32.totalorder (!%p141_p9), %s510_s16, 1  ;;  %vm171_vm0 = vcmask (!%p141_p9), 261120   ;;  %v398_v4 = vld [vmem:[%s602_s1] sm:$0xff] (!%p141_p9)   ;;  %v466_v5 = vmov (!%p141_p9), 0.0   ;;  %vm467_vm1 = vmmov (!%p141_p9), 0   ;;  %v399_v6 = vld [vmem:[%s602_s1 + $0x8] sm:$0xff] (!%p141_p9)  }
   0xe   : > { %144 = sbr.rel (%p141_p9) target bundleno = 424 (0x1a8), region = 32  ;;  %349 = vmatprep.subr.bf16.mxu0 (!%p141_p9), %v466_v5  ;;  %353 = vmatprep.mubr.msk.bf16.mxu0 (!%p141_p9), %vm467_vm1, %v466_v5  ;;  %s161_s6 = sand.u32 (!%p141_p9), 1, %s456_s13   ;;  %v337_v19 = vld [vmem:[%s603_s2] ss:$0 sm:$0xff] (!%p141_p9)  ;;  %vm255_vm2 = vcmask (!%p141_p9), 130048  }
   0xf   : > { %350 = vmatpush3.bf16.msra.mxu0 (!%p141_p9), %v398_v4  ;;  %s334_s7 = sshll.u32 (!%p141_p9), %s161_s6, 3  ;;  %s342_s10 = sshll.u32 (!%p141_p9), %s510_s16, 7 }
  0x10   : > { %351 = vmatprep.subr.bf16.mxu0 (!%p141_p9), %v466_v5  ;;  %s163_s11 = scalar_lea.vmem (!%p141_p9), [#allocation2], %s334_s7  ;;  %s468_s26 = smov (!%p141_p9), [#allocation2]  }
  0x11   : > { %s271_s17 = sshll.u32 (!%p141_p9), %s163_s11, 4  ;;  %s406_s27 = sshll.u32 (!%p141_p9), %s468_s26, 4  ;;  %s561_s17 = int_to_ptr.vmem [resolvable:$true] %s271_s17  ;;  %s407_s27 = int_to_ptr.vmem [resolvable:$false] %s406_s27 }
  0x12   : > { %p409_p0 = scmp.lt.s32.totalorder (!%p141_p9), %s561_s17, %s407_s27 }
  0x13   : > { %352 = vmatpush3.bf16.msra.mxu0 (!%p141_p9), %v399_v6 }
  0x15   : > { %s165_s24 = scalar_select %p164_p10, %s510_s16, 1 }
  0x16   : > { %s258_s16 = scalar_lea.sflag [#allocation3], %s161_s6 }
  0x17   : > { %s345_s25 = sshll.u32 %s165_s24, 4  ;;  %s559_s24 = scalar_lea.hbm %s604_s3, %s342_s10 }
  0x18   : > { %s168_s28 = scalar_lea.vmem %s601_s0, %s345_s25  ;;  %s402_s25 = scalar_lea.vmem %s561_s17, 128 }
  0x19   : > { %v170_v0 = vld [vmem:[%s168_s28 + $0x1] sm:$0xff]  ;;  %p403_p11 = scmp.ne.s32.totalorder %s561_s17, %s402_s25  ;;  %s408_s28 = scalar_lea.vmem %s407_s27, 256 }
  0x1a   : > { %v172_v1 = vsel %vm171_vm0, %v170_v0, 0.0  ;;  %v175_v2 = vmul.f32 %v170_v0, %v170_v0  ;;  %p410_p1 = scmp.lt.s32.totalorder %s408_s28, %s402_s25 }
  0x1b   : > { %173 = vadd.xlane.f32.xlu0 %v172_v1  ;;  %p404_p12 = pnand %p403_p11, %p527_p5 }
  0x1c   : > { %v176_v3 = vsel %vm171_vm0, %v175_v2, 0.0  ;;  %p411_p2 = por %p410_p1, %p409_p0 }
  0x1d   : > { %p405_p13 = pneg %p404_p12 }
  0x1f   : > { %177 = vadd.xlane.f32.xlu0 %v176_v3  ;;  %p412_p3 = pnand %p411_p2, %p405_p13 }
  0xa8   : > { %v174_v7 = vpop.xlane.xlu0 %173 }
  0xa9   : > { %v179_v8 = vmul.f32 0.03125, %v174_v7 }
  0xab   : > { %v181_v10 = vmul.f32 %v179_v8, %v179_v8  ;;  %v184_v15 = vsub.f32 %v170_v0, %v179_v8 }
  0xac   : > { %v178_v9 = vpop.xlane.xlu0 %177 }
  0xad   : > { %v180_v11 = vmul.f32 0.03125, %v178_v9 }
  0xaf   : > { %v182_v12 = vsub.f32 %v180_v11, %v181_v10 }
  0xb1   : > { %v183_v13 = vmax.f32 %v182_v12, 0.0 }
  0xb3   : > { %v185_v14 = vadd.f32 1e-05, %v183_v13 }
  0xb5   : > { %400 = vrsqrt.f32 %v185_v14 }
  0xbf   : > { %v401_v16 = vpop.eup %400 }
  0xc0   : > { %v187_v17 = vmul.f32 %v401_v16, %v184_v15 }
  0xc2   : > { %v188_v18 = vpack.c.bf16 %v187_v17, %v187_v17 }
  0xc4   : > { %354 = vmatmul.mubr.msk.bf16.vlgmr.msra.gmra.mrb[0].mxu0 %vm171_vm0, %v188_v18 }
 0x197   : > { %v249_v20 = vpop.f32.mrb[0].mxu0 }
 0x198   : > { %v250_v21 = vadd.f32 %v337_v19, %v249_v20  ;;  %v355_v22 = vpop.f32.mrb[1].mxu0 }
 0x199   : > { %v252_v23 = vpop.f32.mrb[2].mxu0 }
 0x19a   : > { %v356_v24 = vpop.f32.mrb[3].mxu0  ;;  %256 = vst.msk [vmem:[%s163_s11] sm:$0xff] %vm255_vm2, %v250_v21 }
 0x19b   : > { %415 = shalt.err (!%p412_p3)
}
 0x19c   : > { %s416_s29 = scalar_lea.hbm %s559_s24, 128  ;;  %s420_s5 = scalar_lea.hbm %s604_s3, 256 }
 0x19d   : > { %p417_p4 = scmp.ne.s32.totalorder %s559_s24, %s416_s29  ;;  %p421_p9 = scmp.lt.u32.totalorder %s559_s24, %s604_s3 }
 0x19e   : > { %p422_p10 = scmp.lt.u32.totalorder %s420_s5, %s416_s29  ;;  %p424_p12 = scmp.lt.u32.totalorder %s416_s29, %s559_s24 }
 0x19f   : > { %p418_p7 = pnand %p417_p4, %p527_p5 }
 0x1a0   : > { %p423_p11 = por %p422_p10, %p421_p9 }
 0x1a1   : > { %p419_p8 = pneg %p418_p7 }
 0x1a2   : > { %p425_p13 = por %p424_p12, %p423_p11 }
 0x1a4   : > { %p426_p0 = pnand %p425_p13, %p419_p8 }
 0x1a6   : > { %429 = shalt.err (!%p426_p0)
}
 0x1a7   : > { %357 = dma.vmem_to_hbm [thread:$0]  (%p527_p5), %s561_s17, 128, %s559_s24, %s258_s16  }
 0x1a8 PF: > { %p363_p1 = scmp.ge.s32.totalorder %s464_s15, 2  ;;  %s283_s8 = sand.u32 1, %s452_s12  }
 0x1a9   : > { %s284_s9 = scalar_lea.sflag [#allocation3], %s283_s8 }
 0x1aa   : > { %p360_p2 = pnand %p363_p1, %p531_p6 }
 0x1ac   : > { %447 = dma.done.wait (!%p360_p2), %s284_s9, 128  }
 0x1ad   : > { %449 = vsyncadd (!%p360_p2), %s284_s9, 4294967168  ;;  %p13_p3 = scmp.ge.s32.totalorder %s514_s18, 4   ;;  %s607_s12 = smov %s456_s13 }
 0x1ae   : > { %s608_s13 = smov %s460_s14  ;;  %s609_s14 = smov %s525_s21 }
 0x1af   : > { %s610_s15 = smov %s514_s18  ;;  %15 = sbr.rel (!%p13_p3) target bundleno = 3 (0x3), region = 67 }
 0x1b6   :  { %289 = vsyncpa [#allocation3], 1 }
 0x1b7   :  { %291 = vsyncpa [#allocation3 + $0x1], 1 }

</bundles_post_ra>
